<compile_context>
chip_gen: v7x
topology: tpu7x:2x2x1
jax: 0.10.0
libtpu: 0.0.40
codegen_flags: <defaults>
</compile_context>

<pallas_src>
import functools

import jax
import jax.numpy as jnp
from jax.experimental import pallas as pl
from jax.experimental.pallas import tpu as pltpu


def _round_up(n, m):
    return ((n + m - 1) // m) * m


def _mlp_kernel(x_ref, w1_ref, b1_ref, w2_ref, b2_ref, w3_ref, b3_ref, o_ref):
    # x arrives in f32 and is cast to the weight dtype in-register; all matmuls
    # accumulate in f32 on the MXU; bias add + ReLU stay in f32 on the VPU.
    cd = w1_ref.dtype
    x = x_ref[...].astype(cd)
    h = jnp.dot(x, w1_ref[...], preferred_element_type=jnp.float32) + b1_ref[...]
    h = jnp.maximum(h, 0.0)
    h = jnp.dot(h.astype(cd), w2_ref[...],
                preferred_element_type=jnp.float32) + b2_ref[...]
    h = jnp.maximum(h, 0.0)
    out = jnp.dot(h.astype(cd), w3_ref[...],
                  preferred_element_type=jnp.float32) + b3_ref[...]
    o_ref[...] = out.astype(o_ref.dtype)


def _choose_tile(batch, in_dim, out_dim, hid, tm_max):
    """Batch tile: large enough to amortize per-step overhead, small enough to fit
    VMEM (v7x: 64 MiB), multiple of 16 (bf16 packing), and giving v7x's two
    TensorCores at least two grid steps when there is enough batch to split."""
    if batch <= 16:
        return batch                          # block dim == full array dim (always legal)
    tm = min(int(tm_max), _round_up(batch, 16))
    # Pipelined bytes per row: f32 x (x2 buffers) + f32 out (x2) + hidden scratch,
    # after the single-buffered resident weights.
    resident = 2 * (in_dim * hid + hid * hid + hid * out_dim) + 4 * (2 * hid + out_dim)
    budget = max(20 * 1024 * 1024 - resident, 2 * 1024 * 1024)
    per_row = 4 * (2 * in_dim + 2 * out_dim + 4 * hid)
    tm = min(tm, max(16, (budget // per_row) // 16 * 16))
    # v7x megacore: ensure >= 2 grid steps so the second TensorCore is not idle.
    if batch > 32 and pl.cdiv(batch, tm) < 2:
        tm = max(16, _round_up(pl.cdiv(batch, 2), 16))
    return tm


@functools.partial(jax.jit, static_argnames=("tm_max",))
def target_network_forward(x, params, *, tm_max=1024):
    """x: (batch, in_dim) float32. params: w1,b1,w2,b2,w3,b3 with weights already in the
    compute dtype (see prepare_params) and f32 biases. Returns (batch, out_dim) float32."""
    w1, b1, w2, b2, w3, b3 = (params[k] for k in ("w1", "b1", "w2", "b2", "w3", "b3"))
    batch, in_dim = x.shape
    hid = w1.shape[1]
    out_dim = w3.shape[1]

    tm = _choose_tile(batch, in_dim, out_dim, hid, tm_max)
    n_tiles = pl.cdiv(batch, tm)

    w_bytes = int(w1.dtype.itemsize) * (in_dim * hid + hid * hid + hid * out_dim)
    b_bytes = 4 * (2 * hid + out_dim)
    flops = 2 * batch * (in_dim * hid + hid * hid + hid * out_dim)
    bytes_accessed = 4 * batch * (in_dim + out_dim) + w_bytes + b_bytes

    # Explicit scoped-VMEM limit: above v5e's 16 MiB default, below v7x's 64 MiB physical.
    vmem_need = (2 * tm * in_dim * 4 + 2 * tm * out_dim * 4 + 4 * tm * hid * 4
                 + w_bytes + b_bytes)
    vmem_limit = int(min(max(int(vmem_need * 1.5), 32 * 1024 * 1024), 56 * 1024 * 1024))

    # Weights/biases: constant index_map -> DMA'd once, VMEM-resident, single-buffered.
    resident = lambda shape: pl.BlockSpec(shape, lambda i: (0, 0),
                                          pipeline_mode=pl.Buffered(1))

    return pl.pallas_call(
        _mlp_kernel,
        out_shape=jax.ShapeDtypeStruct((batch, out_dim), jnp.float32),
        grid=(n_tiles,),
        in_specs=[
            pl.BlockSpec((tm, in_dim), lambda i: (i, 0)),   # x tile (f32, pipelined)
            resident((in_dim, hid)),                        # w1
            resident((1, hid)),                             # b1
            resident((hid, hid)),                           # w2
            resident((1, hid)),                             # b2
            resident((hid, out_dim)),                       # w3
            resident((1, out_dim)),                         # b3
        ],
        out_specs=pl.BlockSpec((tm, out_dim), lambda i: (i, 0)),
        compiler_params=pltpu.CompilerParams(
            dimension_semantics=("parallel",),
            vmem_limit_bytes=vmem_limit,
        ),
        cost_estimate=pl.CostEstimate(
            flops=int(flops), transcendentals=0, bytes_accessed=int(bytes_accessed)),
    )(x, w1, b1, w2, b2, w3, b3)


def init_target_network(key, in_dim, out_dim, hid=128):
    """Orthogonal weights (gain=1.0), zero biases, matching the PyTorch init.
    Weights stored as (in_features, out_features) so the kernel computes x @ W + b."""
    k1, k2, k3 = jax.random.split(key, 3)
    ortho = jax.nn.initializers.orthogonal(scale=1.0)
    return {
        "w1": ortho(k1, (in_dim, hid), jnp.float32), "b1": jnp.zeros((1, hid), jnp.float32),
        "w2": ortho(k2, (hid, hid), jnp.float32),    "b2": jnp.zeros((1, hid), jnp.float32),
        "w3": ortho(k3, (hid, out_dim), jnp.float32), "b3": jnp.zeros((1, out_dim), jnp.float32),
    }


def prepare_params(params, compute_dtype=jnp.bfloat16):
    """One-time cast of the frozen target-net weights to the MXU compute dtype
    (hoisted out of the forward path -> no per-call weight convert); biases stay f32."""
    p = {}
    for k in ("w1", "w2", "w3"):
        p[k] = params[k].astype(compute_dtype)
    for k in ("b1", "b2", "b3"):
        p[k] = params[k].astype(jnp.float32)
    return p


def _ref_forward(x, params_f32, cd):
    """Pure-JAX reference with the same mixed-precision recipe as the kernel."""
    h = jnp.dot(x.astype(cd), params_f32["w1"].astype(cd),
                preferred_element_type=jnp.float32) + params_f32["b1"]
    h = jnp.maximum(h, 0.0)
    h = jnp.dot(h.astype(cd), params_f32["w2"].astype(cd),
                preferred_element_type=jnp.float32) + params_f32["b2"]
    h = jnp.maximum(h, 0.0)
    return jnp.dot(h.astype(cd), params_f32["w3"].astype(cd),
                   preferred_element_type=jnp.float32) + params_f32["b3"]


if __name__ == "__main__":
    key = jax.random.PRNGKey(0)
    in_dim, out_dim, hid = 32, 16, 128
    batch = 2

    pkey, xkey = jax.random.split(key)
    params_f32 = init_target_network(pkey, in_dim, out_dim, hid)
    params = prepare_params(params_f32)          # frozen weights cast to bf16 exactly once
    x = jax.random.normal(xkey, (batch, in_dim), jnp.float32)

    y = target_network_forward(x, params)
    jax.block_until_ready(y)
    assert y.shape == (batch, out_dim)
    assert y.dtype == jnp.float32

    # Tight check vs a pure-JAX reference using the identical bf16-in / f32-accum recipe.
    y_ref_bf16 = _ref_forward(x, params_f32, jnp.bfloat16)
    assert jnp.allclose(y, y_ref_bf16, atol=1e-3, rtol=1e-3), (
        float(jnp.max(jnp.abs(y - y_ref_bf16))))

    # Loose check vs the full-f32 PyTorch-equivalent forward (bf16 rounding only difference).
    y_ref_f32 = _ref_forward(x, params_f32, jnp.float32)
    assert jnp.allclose(y, y_ref_f32, atol=5e-2, rtol=5e-2), (
        float(jnp.max(jnp.abs(y - y_ref_f32))))

    print("KERNEL_OK")
</pallas_src>

<mosaic_0001>
module attributes {stable_mosaic.version = 11 : i64} {
  func.func @_mlp_kernel(%arg0: i32, %arg1: memref<2x32xf32, #tpu.memory_space<vmem>>, %arg2: memref<32x128xbf16, #tpu.memory_space<vmem>>, %arg3: memref<1x128xf32, #tpu.memory_space<vmem>>, %arg4: memref<128x128xbf16, #tpu.memory_space<vmem>>, %arg5: memref<1x128xf32, #tpu.memory_space<vmem>>, %arg6: memref<128x16xbf16, #tpu.memory_space<vmem>>, %arg7: memref<1x16xf32, #tpu.memory_space<vmem>>, %arg8: memref<2x16xf32, #tpu.memory_space<vmem>>) attributes {dimension_semantics = [#tpu.dimension_semantics<parallel>], iteration_bounds = array<i64: 1>, scalar_prefetch = 0 : i64, scratch_operands = 0 : i64, tpu.core_type = #tpu.core_type<tc>, window_params = [{transform_indices = @transform_0, window_bounds = array<i64: 2, 32>}, {pipeline_mode = #tpu.pipeline_mode<synchronous>, transform_indices = @transform_1, window_bounds = array<i64: 32, 128>}, {pipeline_mode = #tpu.pipeline_mode<synchronous>, transform_indices = @transform_2, window_bounds = array<i64: 1, 128>}, {pipeline_mode = #tpu.pipeline_mode<synchronous>, transform_indices = @transform_3, window_bounds = array<i64: 128, 128>}, {pipeline_mode = #tpu.pipeline_mode<synchronous>, transform_indices = @transform_4, window_bounds = array<i64: 1, 128>}, {pipeline_mode = #tpu.pipeline_mode<synchronous>, transform_indices = @transform_5, window_bounds = array<i64: 128, 16>}, {pipeline_mode = #tpu.pipeline_mode<synchronous>, transform_indices = @transform_6, window_bounds = array<i64: 1, 16>}, {transform_indices = @transform_7, window_bounds = array<i64: 2, 16>}]} {
    %c0 = arith.constant 0 : index
    %c0_0 = arith.constant 0 : index
    %0 = vector.load %arg1[%c0, %c0_0] : memref<2x32xf32, #tpu.memory_space<vmem>>, vector<2x32xf32>
    %1 = arith.truncf %0 : vector<2x32xf32> to vector<2x32xbf16>
    %c0_1 = arith.constant 0 : index
    %c0_2 = arith.constant 0 : index
    %2 = vector.load %arg2[%c0_1, %c0_2] : memref<32x128xbf16, #tpu.memory_space<vmem>>, vector<32x128xbf16>
    %cst = arith.constant dense<0.000000e+00> : vector<2x128xf32>
    %3 = tpu.matmul %1, %2, %cst {dimension_numbers = #tpu.dot_dimension_numbers<[1], [0], [0], [1], [0, 0, 1, 1], [], []>} : vector<2x32xbf16>, vector<32x128xbf16>, vector<2x128xf32> -> vector<2x128xf32>
    %c0_3 = arith.constant 0 : index
    %c0_4 = arith.constant 0 : index
    %4 = vector.load %arg3[%c0_3, %c0_4] : memref<1x128xf32, #tpu.memory_space<vmem>>, vector<1x128xf32>
    %5 = vector.broadcast %4 : vector<1x128xf32> to vector<2x128xf32>
    %6 = arith.addf %3, %5 : vector<2x128xf32>
    %cst_5 = arith.constant 0.000000e+00 : f32
    %7 = vector.broadcast %cst_5 : f32 to vector<2x128xf32>
    %8 = arith.maximumf %6, %7 : vector<2x128xf32>
    %9 = arith.truncf %8 : vector<2x128xf32> to vector<2x128xbf16>
    %c0_6 = arith.constant 0 : index
    %c0_7 = arith.constant 0 : index
    %10 = vector.load %arg4[%c0_6, %c0_7] : memref<128x128xbf16, #tpu.memory_space<vmem>>, vector<128x128xbf16>
    %cst_8 = arith.constant dense<0.000000e+00> : vector<2x128xf32>
    %11 = tpu.matmul %9, %10, %cst_8 {dimension_numbers = #tpu.dot_dimension_numbers<[1], [0], [0], [1], [0, 0, 1, 1], [], []>} : vector<2x128xbf16>, vector<128x128xbf16>, vector<2x128xf32> -> vector<2x128xf32>
    %c0_9 = arith.constant 0 : index
    %c0_10 = arith.constant 0 : index
    %12 = vector.load %arg5[%c0_9, %c0_10] : memref<1x128xf32, #tpu.memory_space<vmem>>, vector<1x128xf32>
    %13 = vector.broadcast %12 : vector<1x128xf32> to vector<2x128xf32>
    %14 = arith.addf %11, %13 : vector<2x128xf32>
    %cst_11 = arith.constant 0.000000e+00 : f32
    %15 = vector.broadcast %cst_11 : f32 to vector<2x128xf32>
    %16 = arith.maximumf %14, %15 : vector<2x128xf32>
    %17 = arith.truncf %16 : vector<2x128xf32> to vector<2x128xbf16>
    %c0_12 = arith.constant 0 : index
    %c0_13 = arith.constant 0 : index
    %18 = vector.load %arg6[%c0_12, %c0_13] : memref<128x16xbf16, #tpu.memory_space<vmem>>, vector<128x16xbf16>
    %cst_14 = arith.constant dense<0.000000e+00> : vector<2x16xf32>
    %19 = tpu.matmul %17, %18, %cst_14 {dimension_numbers = #tpu.dot_dimension_numbers<[1], [0], [0], [1], [0, 0, 1, 1], [], []>} : vector<2x128xbf16>, vector<128x16xbf16>, vector<2x16xf32> -> vector<2x16xf32>
    %c0_15 = arith.constant 0 : index
    %c0_16 = arith.constant 0 : index
    %20 = vector.load %arg7[%c0_15, %c0_16] : memref<1x16xf32, #tpu.memory_space<vmem>>, vector<1x16xf32>
    %21 = vector.broadcast %20 : vector<1x16xf32> to vector<2x16xf32>
    %22 = arith.addf %19, %21 : vector<2x16xf32>
    %c0_17 = arith.constant 0 : index
    %c0_18 = arith.constant 0 : index
    %23 = vector.load %arg8[%c0_17, %c0_18] : memref<2x16xf32, #tpu.memory_space<vmem>>, vector<2x16xf32>
    tpu.vector_store %arg8[%c0_17, %c0_18], %22 {strides = array<i32>} : memref<2x16xf32, #tpu.memory_space<vmem>>, vector<2x16xf32>,
    return
  }
  func.func @transform_0(%arg0: i32) -> (i32, i32) {
    %c0_i32 = arith.constant 0 : i32
    %c0_i32_0 = arith.constant 0 : i32
    return %arg0, %c0_i32 : i32, i32
  }
  func.func @transform_1(%arg0: i32) -> (i32, i32) {
    %c0_i32 = arith.constant 0 : i32
    %c0_i32_0 = arith.constant 0 : i32
    %c0_i32_1 = arith.constant 0 : i32
    return %c0_i32, %c0_i32_0 : i32, i32
  }
  func.func @transform_2(%arg0: i32) -> (i32, i32) {
    %c0_i32 = arith.constant 0 : i32
    %c0_i32_0 = arith.constant 0 : i32
    %c0_i32_1 = arith.constant 0 : i32
    return %c0_i32, %c0_i32_0 : i32, i32
  }
  func.func @transform_3(%arg0: i32) -> (i32, i32) {
    %c0_i32 = arith.constant 0 : i32
    %c0_i32_0 = arith.constant 0 : i32
    %c0_i32_1 = arith.constant 0 : i32
    return %c0_i32, %c0_i32_0 : i32, i32
  }
  func.func @transform_4(%arg0: i32) -> (i32, i32) {
    %c0_i32 = arith.constant 0 : i32
    %c0_i32_0 = arith.constant 0 : i32
    %c0_i32_1 = arith.constant 0 : i32
    return %c0_i32, %c0_i32_0 : i32, i32
  }
  func.func @transform_5(%arg0: i32) -> (i32, i32) {
    %c0_i32 = arith.constant 0 : i32
    %c0_i32_0 = arith.constant 0 : i32
    %c0_i32_1 = arith.constant 0 : i32
    return %c0_i32, %c0_i32_0 : i32, i32
  }
  func.func @transform_6(%arg0: i32) -> (i32, i32) {
    %c0_i32 = arith.constant 0 : i32
    %c0_i32_0 = arith.constant 0 : i32
    %c0_i32_1 = arith.constant 0 : i32
    return %c0_i32, %c0_i32_0 : i32, i32
  }
  func.func @transform_7(%arg0: i32) -> (i32, i32) {
    %c0_i32 = arith.constant 0 : i32
    %c0_i32_0 = arith.constant 0 : i32
    return %arg0, %c0_i32 : i32, i32
  }
}

</mosaic_0001>

<bundles_post_ra>
// kernel: target_network_forward.1
= control target key start
LH: loop header
LB: loop body
LE: loop exit
PB: predicated region body
PF: predicated region fallthrough
CT: control target
= control target key end

     0   :  { %v475_v1 = vmov 0.0   ;;  %vm476_vm0 = vmmov 0   ;;  %vm53_vm1 = vcmask 261120   ;;  %s620_s0 = inlined_call_operand.vmem [shape: f32[2,32], index: 0, kind: input, shape index: {}]   ;;  %s621_s1 = inlined_call_operand.vmem [shape: bf16[32,128], index: 1, kind: input, shape index: {}]   ;;  %s622_s2 = inlined_call_operand.vmem [shape: f32[1,128], index: 2, kind: input, shape index: {}]   ;;  %s623_s3 = inlined_call_operand.vmem [shape: bf16[128,128], index: 3, kind: input, shape index: {}]   ;;  %s624_s4 = inlined_call_operand.vmem [shape: f32[1,128], index: 4, kind: input, shape index: {}]   ;;  %s625_s5 = inlined_call_operand.vmem [shape: bf16[128,16], index: 5, kind: input, shape index: {}]   ;;  %s626_s6 = inlined_call_operand.vmem [shape: f32[1,16], index: 6, kind: input, shape index: {}]   ;;  %s627_s7 = inlined_call_operand.hbm [shape: f32[2,16], index: 7, kind: output, shape index: {}]  }
   0x1   :  { %v433_v0 = vld [vmem:[%s621_s1] sm:$0xff]   ;;  %382 = vmatprep.subr.bf16.mxu0 %v475_v1  ;;  %v434_v2 = vld [vmem:[%s621_s1 + $0x8] sm:$0xff]   ;;  %390 = vmatprep.subr.bf16.mxu1 %v475_v1  ;;  %v437_v7 = vld [vmem:[%s623_s3 + $0x10] sm:$0xff]  }
   0x2   :  { %383 = vmatpush3.bf16.msra.mxu0 %v433_v0  ;;  %386 = vmatprep.mubr.msk.bf16.mxu0 %vm476_vm0, %v475_v1  ;;  %v28_v3 = vld [vmem:[%s620_s0] sm:$0x3]  ;;  %v436_v5 = vld [vmem:[%s623_s3 + $0x8] sm:$0xff]   ;;  %v438_v8 = vld [vmem:[%s623_s3 + $0x18] sm:$0xff]  }
   0x3   :  { %v435_v4 = vld [vmem:[%s623_s3] sm:$0xff]   ;;  %384 = vmatprep.subr.bf16.mxu0 %v475_v1  ;;  %406 = vmatprep.mubr.msk.bf16.mxu1 %vm476_vm0, %v475_v1  ;;  %v29_v6 = vpack.c.bf16 %v28_v3, %v28_v3 }
   0x4   :  { %391 = vmatpush3.bf16.msra.mxu1 %v435_v4 }
   0x5   :  { %392 = vmatprep.subr.bf16.mxu1 %v475_v1 }
   0x6   :  { %385 = vmatpush3.bf16.msra.mxu0 %v434_v2 }
   0x7   :  { %410 = vmatprep.subr.bf16.mxu0 %v475_v1 }
   0x8   :  { %393 = vmatpush3.bf16.msra.mxu1 %v436_v5 }
   0x9   :  { %387 = vmatmul.mubr.msk.bf16.vlgmr.msra.gmra.mrb[0].mxu0 %vm53_vm1, %v29_v6  ;;  %394 = vmatprep.subr.bf16.mxu1 %v475_v1 }
   0xa   :  { %426 = vmatprep.mubr.msk.bf16.mxu0 %vm476_vm0, %v475_v1 }
   0xc   :  { %395 = vmatpush3.bf16.msra.mxu1 %v437_v7 }
   0xd   :  { %396 = vmatprep.subr.bf16.mxu1 %v475_v1 }
   0xe   :  { %12 = vsyncpa [#allocation3], 0  ;;  %v439_v9 = vld [vmem:[%s623_s3 + $0x20] sm:$0xff]   ;;  %v440_v10 = vld [vmem:[%s623_s3 + $0x28] sm:$0xff]   ;;  %s477_s16 = smov [#allocation2]   ;;  %vm323_vm2 = vcmask 123904  }
   0xf   :  { %v441_v11 = vld [vmem:[%s623_s3 + $0x30] sm:$0xff]   ;;  %v442_v12 = vld [vmem:[%s623_s3 + $0x38] sm:$0xff]   ;;  %v443_v13 = vld [vmem:[%s625_s5] sm:$0xff]   ;;  %s331_s17 = sshll.u32 %s477_s16, 4  ;;  %s332_s17 = int_to_ptr.vmem [resolvable:$true] %s331_s17 }
  0x10   :  { %397 = vmatpush3.bf16.msra.mxu1 %v438_v8  ;;  %411 = vmatpush3.bf16.msra.mxu0 %v443_v13  ;;  %v444_v14 = vld [vmem:[%s625_s5 + $0x8] sm:$0xff]   ;;  %v445_v15 = vld [vmem:[%s625_s5 + $0x10] sm:$0xff]   ;;  %v446_v16 = vld [vmem:[%s625_s5 + $0x18] sm:$0xff]   ;;  %p456_p1 = scmp.lt.s32.totalorder %s332_s17, %s332_s17 }
  0x11   :  { %398 = vmatprep.subr.bf16.mxu1 %v475_v1  ;;  %412 = vmatprep.subr.bf16.mxu0 %v475_v1  ;;  %v447_v17 = vld [vmem:[%s625_s5 + $0x20] sm:$0xff]   ;;  %v448_v18 = vld [vmem:[%s625_s5 + $0x28] sm:$0xff]   ;;  %v449_v27 = vld [vmem:[%s625_s5 + $0x30] sm:$0xff]  }
  0x12   :  { %v339_v19 = vld [vmem:[%s622_s2] ss:$0 sm:$0xff]  ;;  %v450_v28 = vld [vmem:[%s625_s5 + $0x38] sm:$0xff]  }
  0x13   :  { %v343_v29 = vld [vmem:[%s624_s4] ss:$0 sm:$0xff]  ;;  %s451_s4 = scalar_lea.vmem %s332_s17, 32 }
  0x14   :  { %399 = vmatpush3.bf16.msra.mxu1 %v439_v9  ;;  %413 = vmatpush3.bf16.msra.mxu0 %v444_v14  ;;  %v352_v37 = vld [vmem:[%s626_s6] ss:$0 sm:$0xff]  ;;  %p452_p0 = scmp.ne.s32.totalorder %s332_s17, %s451_s4  ;;  %p457_p2 = scmp.lt.s32.totalorder %s451_s4, %s451_s4 }
  0x15   :  { %400 = vmatprep.subr.bf16.mxu1 %v475_v1  ;;  %414 = vmatprep.subr.bf16.mxu0 %v475_v1 }
  0x16   :  { %p458_p3 = por %p457_p2, %p456_p1 }
  0x18   :  { %401 = vmatpush3.bf16.msra.mxu1 %v440_v10  ;;  %415 = vmatpush3.bf16.msra.mxu0 %v445_v15  ;;  %p459_p4 = pnand %p458_p3, %p452_p0 }
  0x19   :  { %402 = vmatprep.subr.bf16.mxu1 %v475_v1  ;;  %416 = vmatprep.subr.bf16.mxu0 %v475_v1 }
  0x1c   :  { %403 = vmatpush3.bf16.msra.mxu1 %v441_v11  ;;  %417 = vmatpush3.bf16.msra.mxu0 %v446_v16 }
  0x1d   :  { %404 = vmatprep.subr.bf16.mxu1 %v475_v1  ;;  %418 = vmatprep.subr.bf16.mxu0 %v475_v1 }
  0x20   :  { %405 = vmatpush3.bf16.msra.mxu1 %v442_v12  ;;  %419 = vmatpush3.bf16.msra.mxu0 %v447_v17 }
  0x21   :  { %420 = vmatprep.subr.bf16.mxu0 %v475_v1 }
  0x24   :  { %421 = vmatpush3.bf16.msra.mxu0 %v448_v18 }
  0x25   :  { %422 = vmatprep.subr.bf16.mxu0 %v475_v1 }
  0x28   :  { %423 = vmatpush3.bf16.msra.mxu0 %v449_v27 }
  0x29   :  { %424 = vmatprep.subr.bf16.mxu0 %v475_v1 }
  0x2c   :  { %425 = vmatpush3.bf16.msra.mxu0 %v450_v28 }
  0xdc   :  { %v91_v20 = vpop.f32.mrb[0].mxu0 }
  0xdd   :  { %v92_v21 = vadd.f32 %v339_v19, %v91_v20  ;;  %v388_v22 = vpop.f32.mrb[1].mxu0 }
  0xde   :  { %v94_v23 = vpop.f32.mrb[2].mxu0 }
  0xdf   :  { %v97_v24 = vmax.f32 %v92_v21, 0.0  ;;  %v389_v25 = vpop.f32.mrb[3].mxu0 }
  0xe1   :  { %v98_v26 = vpack.c.bf16 %v97_v24, %v97_v24 }
  0xe3   :  { %407 = vmatmul.mubr.bf16.vlgmr.msra.gmra.mrb[0].mxu1 %v98_v26 }
 0x1b6   :  { %v204_v30 = vpop.f32.mrb[0].mxu1 }
 0x1b7   :  { %v205_v31 = vadd.f32 %v343_v29, %v204_v30  ;;  %v408_v32 = vpop.f32.mrb[1].mxu1 }
 0x1b8   :  { %v207_v33 = vpop.f32.mrb[2].mxu1 }
 0x1b9   :  { %v210_v34 = vmax.f32 %v205_v31, 0.0  ;;  %v409_v35 = vpop.f32.mrb[3].mxu1 }
 0x1bb   :  { %v211_v36 = vpack.c.bf16 %v210_v34, %v210_v34 }
 0x1bd   :  { %427 = vmatmul.mubr.bf16.vlgmr.msra.gmra.mrb[4].mxu0 %v211_v36 }
 0x290   :  { %v317_v38 = vpop.f32.mrb[4].mxu0 }
 0x291   :  { %v318_v39 = vadd.f32 %v352_v37, %v317_v38  ;;  %v428_v40 = vpop.f32.mrb[5].mxu0 }
 0x292   :  { %v320_v41 = vpop.f32.mrb[6].mxu0 }
 0x293   :  { %v429_v42 = vpop.f32.mrb[7].mxu0  ;;  %324 = vst.msk [vmem:[#allocation2] sm:$0x3] %vm323_vm2, %v318_v39 }
 0x294   :  { %462 = shalt.err (!%p459_p4)
}
 0x295   :  { %s463_s6 = scalar_lea.hbm %s627_s7, 32 }
 0x296   :  { %p464_p5 = scmp.ne.s32.totalorder %s627_s7, %s463_s6  ;;  %p467_p6 = scmp.lt.u32.totalorder %s463_s6, %s627_s7 }
 0x298   :  { %p469_p7 = pnand %p467_p6, %p464_p5 }
 0x29a   :  { %472 = shalt.err (!%p469_p7)
}
 0x29b   :  { %334 = dma.vmem_to_hbm [thread:$0]  %s332_s17, 32, %s627_s7, [#allocation3]  }
 0x29c   :  { %473 = dma.done.wait [#allocation3], 32  }
 0x29d   :  { %474 = vsyncadd [#allocation3], 4294967264 }
 0x29e   :  { %338 = vsyncpa [#allocation3], 1 }

</bundles_post_ra>
